<compile_context>
chip_gen: v6e
topology: v6e:2x2x1
jax: 0.10.0
libtpu: 0.0.40
codegen_flags: <defaults>
</compile_context>

<pallas_src>
import math

import jax
import jax.numpy as jnp
import numpy as np
from jax.experimental import pallas as pl
from jax.experimental.pallas import tpu as pltpu


# ----------------------------------------------------------------------------
# Pallas kernels
# ----------------------------------------------------------------------------
def _copy_kernel(x_ref, o_ref):
    # replicates torch's .resize_().copy_() : identity copy through VMEM
    o_ref[...] = x_ref[...]


# ----------------------------------------------------------------------------
# Copy wrapper: lane-dense, large blocks, ragged-tail safe
# ----------------------------------------------------------------------------
def _choose_lane_width(total_elems):
    """Largest lane-dense width (multiple of 128) that divides the blob."""
    for lw in (4096, 2048, 1024, 512, 256, 128):
        if total_elems % lw == 0:
            return lw
    return None


def _pallas_copy_2d(x2d, target_block_bytes=4 * 1024 * 1024):
    """Tiled identity copy of a 2-D array through VMEM.

    Block sizing: ~4 MiB per block -> (in + out) x double-buffer ~16 MiB,
    comfortably under the 32 MiB scoped VMEM limit requested below (safe on
    v7x's 64 MiB physical VMEM and raises v5e above its 16 MiB default).
    """
    R, C = x2d.shape
    bytes_per_row = max(1, C * x2d.dtype.itemsize)
    tile_rows = max(1, min(R, target_block_bytes // bytes_per_row))
    if tile_rows >= 8:
        tile_rows -= tile_rows % 8  # keep sublane-aligned blocks
    grid = (pl.cdiv(R, tile_rows),)  # ragged last tile -> masked stores
    return pl.pallas_call(
        _copy_kernel,
        out_shape=jax.ShapeDtypeStruct((R, C), x2d.dtype),
        grid_spec=pl.GridSpec(
            grid=grid,
            in_specs=[pl.BlockSpec((tile_rows, C), lambda i: (i, 0))],
            out_specs=pl.BlockSpec((tile_rows, C), lambda i: (i, 0)),
        ),
        compiler_params=pltpu.CompilerParams(
            dimension_semantics=("parallel",),   # lets v7x's 2 TCs split the grid
            vmem_limit_bytes=32 * 1024 * 1024,
        ),
    )(x2d)


def caffedata_forward(data_blob, label_blob=None):
    """Mirrors CaffeData.forward(): copy blobs into the module buffers and
    return (data,) or (data, label)."""
    # TODO(synk): the Caffe net forward (prototxt/caffemodel, MPI rank/size,
    # file I/O) and the overlap=True `window_stack` path have no Pallas
    # equivalent; the blobs are taken as input arrays instead.
    shape = data_blob.shape
    total = math.prod(shape)
    lane_w = _choose_lane_width(total)
    if lane_w is not None:
        flat = data_blob.reshape(total // lane_w, lane_w)
    else:
        # rare fallback for odd element counts: keep the natural last dim
        flat = data_blob.reshape(-1, shape[-1])
    data = _pallas_copy_2d(flat).reshape(shape)

    if label_blob is not None:
        # Tiny (N,)-ish blob: a dedicated pallas_call would be pure launch
        # overhead (padded (8,128) tile for ~8 bytes). Plain jnp copy is
        # semantically identical (JAX arrays are immutable).
        label = jnp.asarray(label_blob)
        return data, label
    return data


# ----------------------------------------------------------------------------
# to_image: vectorized mean add on a lane-dense (C, H*W) view
# ----------------------------------------------------------------------------
def caffedata_to_image(data_chw, mean_value=None):
    """Mirrors CaffeData.to_image(): CHW float -> HWC uint8 with mean added
    and BGR->RGB channel reorder (uint8 wraparound matches np.astype)."""
    if mean_value is None:
        mean_value = [104.0, 117.0, 123.0]
    C, H, W = data_chw.shape
    HW = H * W
    mean_vals = tuple(float(v) for v in mean_value)
    flat = data_chw.reshape(C, HW)  # lane-dense last dim (H*W)

    def _add_mean_kernel(x_ref, o_ref):
        # One vectorized VPU add over the whole tile.  The per-channel mean is
        # built from baked-in scalar constants via a channel-index iota and a
        # short select chain (no per-row partial stores, no mean DMA).
        x = x_ref[...]
        cidx = jax.lax.broadcasted_iota(jnp.int32, x.shape, 0)
        m = jnp.full(x.shape, mean_vals[0], dtype=x.dtype)
        for c in range(1, C):
            m = jnp.where(cidx == c, jnp.asarray(mean_vals[c], x.dtype), m)
        o_ref[...] = x + m

    # Column tiling so very large images still fit comfortably in VMEM.
    col_tile = HW if HW <= 16384 else 16384  # 16384 is a multiple of 128
    grid = (pl.cdiv(HW, col_tile),)
    shifted = pl.pallas_call(
        _add_mean_kernel,
        out_shape=jax.ShapeDtypeStruct((C, HW), data_chw.dtype),
        grid_spec=pl.GridSpec(
            grid=grid,
            in_specs=[pl.BlockSpec((C, col_tile), lambda j: (0, j))],
            out_specs=pl.BlockSpec((C, col_tile), lambda j: (0, j)),
        ),
        compiler_params=pltpu.CompilerParams(
            dimension_semantics=("parallel",),
            vmem_limit_bytes=32 * 1024 * 1024,
        ),
    )(flat).reshape(C, H, W)

    # TODO(synk): the CHW->HWC transpose, BGR->RGB reorder and uint8 wraparound
    # cast produce an (H, W, 3) uint8 slab whose 3-wide last dim maps poorly
    # onto TPU (8,128) vreg tiles; these trivial reorders are left to XLA glue.
    im = jnp.moveaxis(shifted, 0, -1)            # CHW -> HWC
    return im.astype(jnp.uint8)[:, :, ::-1]      # BGR -> RGB, i.e. (2, 1, 0)


# ----------------------------------------------------------------------------
# Driver
# ----------------------------------------------------------------------------
if __name__ == "__main__":
    key = jax.random.PRNGKey(0)
    kd, kl = jax.random.split(key)

    # Synthetic "Caffe blobs" (deterministic): batch=2, channels=3, 16x16 data
    # blob and a per-image scalar label blob, as a typical Caffe data layer
    # with tops = [data, label] would produce.
    N, C, H, W = 2, 3, 16, 16
    data_blob = jax.random.normal(kd, (N, C, H, W), dtype=jnp.float32) * 10.0
    label_blob = jax.random.randint(kl, (N,), 0, 10).astype(jnp.float32)

    fwd = jax.jit(caffedata_forward)
    to_img = jax.jit(caffedata_to_image)

    data_out, label_out = fwd(data_blob, label_blob)
    img = to_img(data_out[0])

    jax.block_until_ready((data_out, label_out, img))

    # sanity: the forward pass is an exact copy of the blobs
    assert data_out.shape == (N, C, H, W) and data_out.dtype == jnp.float32
    assert label_out.shape == (N,) and label_out.dtype == jnp.float32
    assert bool(jnp.all(data_out == data_blob))
    assert bool(jnp.all(label_out == label_blob))
    assert img.shape == (H, W, C) and img.dtype == jnp.uint8

    # sanity: to_image matches the numpy reference (wraparound uint8, BGR->RGB)
    ref = (np.moveaxis(np.asarray(data_out[0]), 0, -1)
           + np.asarray([104.0, 117.0, 123.0], dtype=np.float32))
    ref = ref.astype(np.uint8)[:, :, (2, 1, 0)]
    assert np.array_equal(np.asarray(img), ref)

    print("KERNEL_OK")
</pallas_src>

<mosaic_0001>
module attributes {stable_mosaic.version = 11 : i64} {
  func.func @_copy_kernel(%arg0: i32, %arg1: memref<3x512xf32, #tpu.memory_space<vmem>>, %arg2: memref<3x512xf32, #tpu.memory_space<vmem>>) attributes {dimension_semantics = [#tpu.dimension_semantics<parallel>], iteration_bounds = array<i64: 1>, scalar_prefetch = 0 : i64, scratch_operands = 0 : i64, tpu.core_type = #tpu.core_type<tc>, window_params = [{transform_indices = @transform_0, window_bounds = array<i64: 3, 512>}, {transform_indices = @transform_1, window_bounds = array<i64: 3, 512>}]} {
    %c0 = arith.constant 0 : index
    %c0_0 = arith.constant 0 : index
    %0 = vector.load %arg1[%c0, %c0_0] : memref<3x512xf32, #tpu.memory_space<vmem>>, vector<3x512xf32>
    %c0_1 = arith.constant 0 : index
    %c0_2 = arith.constant 0 : index
    %1 = vector.load %arg2[%c0_1, %c0_2] : memref<3x512xf32, #tpu.memory_space<vmem>>, vector<3x512xf32>
    tpu.vector_store %arg2[%c0_1, %c0_2], %0 {strides = array<i32>} : memref<3x512xf32, #tpu.memory_space<vmem>>, vector<3x512xf32>,
    return
  }
  func.func @transform_0(%arg0: i32) -> (i32, i32) {
    %c0_i32 = arith.constant 0 : i32
    %c0_i32_0 = arith.constant 0 : i32
    return %arg0, %c0_i32 : i32, i32
  }
  func.func @transform_1(%arg0: i32) -> (i32, i32) {
    %c0_i32 = arith.constant 0 : i32
    %c0_i32_0 = arith.constant 0 : i32
    return %arg0, %c0_i32 : i32, i32
  }
}

</mosaic_0001>

<bundles_post_ra>
// kernel: caffedata_forward.1
= control target key start
LH: loop header
LB: loop body
LE: loop exit
PB: predicated region body
PF: predicated region fallthrough
CT: control target
= control target key end

     0   :  { %s38_s0 = inlined_call_operand.vmem [shape: f32[3,512], index: 0, kind: input, shape index: {}]   ;;  %s39_s1 = inlined_call_operand.vmem [shape: f32[3,512], index: 1, kind: output, shape index: {}]  }
   0x1   :  { %v8_v0 = vld [vmem:[%s38_s0] sm:$0x77]  ;;  %v9_v1 = vld [vmem:[%s38_s0 + $0x8] sm:$0x77] }
   0x2   :  { %10 = vst [vmem:[%s39_s1] sm:$0x77] %v8_v0  ;;  %11 = vst [vmem:[%s39_s1 + $0x8] sm:$0x77] %v9_v1 }

</bundles_post_ra>
